<compile_context>
chip_gen: v6e
topology: v6e:2x2x1
jax: 0.10.0
libtpu: 0.0.40
codegen_flags: <defaults>
</compile_context>

<pallas_src>
import math

import jax
import jax.numpy as jnp
from jax.experimental import pallas as pl
from jax.experimental.pallas import tpu as pltpu


def _round_up(x, m):
    return ((x + m - 1) // m) * m


def _vmem_capacity_bytes():
    """Generation-aware VMEM capacity (v5e/v6e: 128 MiB, v7x: 64 MiB)."""
    try:
        info = pltpu.get_tpu_info()
        cap = int(getattr(info, "vmem_capacity_bytes"))
        if cap > 0:
            return cap
    except Exception:
        pass
    return 64 * 1024 * 1024  # conservative fallback (v7x per-TensorCore VMEM)


def _largest_divisor_tile(dim, candidates):
    for c in candidates:
        if c <= dim and dim % c == 0:
            return c
    return dim


def _pick_tk(INp, tm, tn, itemsize, budget):
    """Deepest K tile whose double-buffered operand blocks fit the budget."""
    cands = sorted({c for c in (INp, 4096, 2048, 1024, 512, 256, 128)
                    if c <= INp and INp % c == 0}, reverse=True)
    for tk in cands:
        if 2 * (tm + tn) * tk * itemsize + tm * tn * 4 <= budget:
            return tk
    return cands[-1]


# ---------------------------------------------------------------------------
# Per-layer path: general (M, N, K)-tiled Linear kernel (padded operands).
# ---------------------------------------------------------------------------
def _linear_tiled_kernel(x_ref, w_ref, b_ref, o_ref, acc_ref):
    # x_ref: (tm, tk)  activation tile (compute dtype)
    # w_ref: (tk, tn)  weight tile, already transposed to (IN, OUT) at init
    # b_ref: (1,  tn)  f32 bias tile
    # o_ref: (tm, tn)  output tile
    # acc_ref: (tm, tn) f32 accumulator, resident across the K axis
    k = pl.program_id(2)

    @pl.when(k == 0)
    def _init():
        acc_ref[...] = jnp.zeros_like(acc_ref)

    acc_ref[...] += jnp.dot(x_ref[...], w_ref[...],
                            preferred_element_type=jnp.float32)

    @pl.when(k == pl.num_programs(2) - 1)
    def _finalize():
        # Bias add + cast once, in the epilogue; the K loop stays pure MXU.
        o_ref[...] = (acc_ref[...] + b_ref[...]).astype(o_ref.dtype)


def linear_forward_padded(x_p, w_p, b_p, out_dtype, tm):
    """y_p = x_p @ w_p + b_p on already-padded operands (no per-call padding).

    x_p: (Bp, INp) compute dtype, w_p: (INp, OUTp) compute dtype,
    b_p: (1, OUTp) f32.  Bp % tm == 0; INp, OUTp are multiples of 128.
    """
    Bp, INp = x_p.shape
    INp_w, OUTp = w_p.shape
    assert INp_w == INp and b_p.shape == (1, OUTp) and Bp % tm == 0

    itemsize = jnp.dtype(x_p.dtype).itemsize
    tn = _largest_divisor_tile(OUTp, (512, 256, 128))
    tk = _pick_tk(INp, tm, tn, itemsize, budget=24 * 1024 * 1024)
    grid = (Bp // tm, OUTp // tn, INp // tk)

    est = (2 * (tm + tn) * tk * itemsize                      # x/w blocks (x2 buf)
           + 2 * tm * tn * jnp.dtype(out_dtype).itemsize      # out blocks
           + tm * tn * 4                                      # f32 accumulator
           + 2 * tn * 4)                                      # bias blocks
    cap = _vmem_capacity_bytes()
    vmem_limit = int(min(0.85 * cap, max(2 * est, 32 * 1024 * 1024)))

    return pl.pallas_call(
        _linear_tiled_kernel,
        out_shape=jax.ShapeDtypeStruct((Bp, OUTp), out_dtype),
        grid_spec=pltpu.PrefetchScalarGridSpec(
            num_scalar_prefetch=0,
            grid=grid,
            in_specs=[
                pl.BlockSpec((tm, tk), lambda i, j, k: (i, k)),
                pl.BlockSpec((tk, tn), lambda i, j, k: (k, j)),
                pl.BlockSpec((1, tn), lambda i, j, k: (0, j)),
            ],
            out_specs=pl.BlockSpec((tm, tn), lambda i, j, k: (i, j)),
            scratch_shapes=[pltpu.VMEM((tm, tn), jnp.float32)],
        ),
        compiler_params=pltpu.CompilerParams(
            dimension_semantics=("parallel", "parallel", "arbitrary"),
            vmem_limit_bytes=vmem_limit,
        ),
    )(x_p, w_p, b_p)


# ---------------------------------------------------------------------------
# Fused path: one launch, weights VMEM-resident, layer loop unrolled in-kernel.
# ---------------------------------------------------------------------------
def _make_fused_kernel(num_layers, compute_dtype):
    def kernel(*refs):
        # refs = (x, w_0..w_{L-1}, b_0..b_{L-1}, out)
        x_ref = refs[0]
        w_refs = refs[1:1 + num_layers]
        b_refs = refs[1 + num_layers:1 + 2 * num_layers]
        o_ref = refs[1 + 2 * num_layers]

        act = x_ref[...].astype(compute_dtype)
        y = None
        for li in range(num_layers):               # static unroll over layers
            y = jnp.dot(act, w_refs[li][...],      # (tm, INp_l) @ (INp_l, OUTp_l)
                        preferred_element_type=jnp.float32)
            y = y + b_refs[li][...]                # f32 bias add
            if li + 1 < num_layers:
                act = y.astype(compute_dtype)
        o_ref[...] = y.astype(o_ref.dtype)

    return kernel


def sequential_forward_fused(x, w_pads, b_pads, in_dim0, out_dim_last,
                             compute_dtype, tm, vmem_limit):
    """Whole Sequential in one pallas_call; weights resident, acts never in HBM."""
    B, IN0 = x.shape
    assert IN0 == in_dim0
    INp0 = w_pads[0].shape[0]
    OUTp_last = w_pads[-1].shape[1]
    L = len(w_pads)

    Bp = _round_up(B, tm)
    x_p = jnp.zeros((Bp, INp0), compute_dtype).at[:B, :IN0].set(
        x.astype(compute_dtype))

    in_specs = [pl.BlockSpec((tm, INp0), lambda i: (i, 0))]
    for w in w_pads:   # constant index_map -> DMA'd once, reused by all tiles
        in_specs.append(pl.BlockSpec(w.shape, lambda i: (0, 0)))
    for b in b_pads:
        in_specs.append(pl.BlockSpec(b.shape, lambda i: (0, 0)))

    out_p = pl.pallas_call(
        _make_fused_kernel(L, compute_dtype),
        out_shape=jax.ShapeDtypeStruct((Bp, OUTp_last), x.dtype),
        grid_spec=pltpu.PrefetchScalarGridSpec(
            num_scalar_prefetch=0,
            grid=(Bp // tm,),
            in_specs=in_specs,
            out_specs=pl.BlockSpec((tm, OUTp_last), lambda i: (i, 0)),
        ),
        compiler_params=pltpu.CompilerParams(
            dimension_semantics=("parallel",),
            vmem_limit_bytes=vmem_limit,
        ),
    )(x_p, *w_pads, *b_pads)

    return out_p[:B, :out_dim_last]


# ---------------------------------------------------------------------------
# Sequential wrapper mirroring ace.layers.Sequential's API.
# ---------------------------------------------------------------------------
class PallasSequential:
    """Pallas counterpart of Sequential holding Linear layers.

    Parameters are padded / transposed / dtype-converted ONCE at construction.
    """

    def __init__(self, params, compute_dtype=jnp.bfloat16, align=128):
        self.params = list(params)  # [(weight (OUT, IN), bias (OUT,)), ...]
        L = len(self.params)
        assert L >= 1
        self.compute_dtype = jnp.dtype(compute_dtype)

        self.in_dims = [w.shape[1] for (w, _) in self.params]
        self.out_dims = [w.shape[0] for (w, _) in self.params]
        for li in range(1, L):
            assert self.in_dims[li] == self.out_dims[li - 1], "layer width mismatch"

        self.in_pads = [_round_up(d, align) for d in self.in_dims]
        self.out_pads = [_round_up(d, align) for d in self.out_dims]

        # Per-layer padded, pre-transposed (IN, OUT) weights in compute dtype;
        # biases kept in f32 (bias add happens on the f32 accumulator).
        self.w_pads, self.b_pads = [], []
        for li, (w, b) in enumerate(self.params):
            OUT, IN = w.shape
            assert b.shape == (OUT,)
            INp, OUTp = self.in_pads[li], self.out_pads[li]
            wp = jnp.zeros((INp, OUTp), self.compute_dtype).at[:IN, :OUT].set(
                jnp.asarray(w).T.astype(self.compute_dtype))
            bp = jnp.zeros((1, OUTp), jnp.float32).at[0, :OUT].set(
                jnp.asarray(b, jnp.float32))
            self.w_pads.append(wp)
            self.b_pads.append(bp)

        self._vmem_cap = _vmem_capacity_bytes()

    # -- Sequential API ----------------------------------------------------
    def __len__(self):
        return len(self.params)

    def __getitem__(self, i):
        return self.params[i]

    def forward_between(self, i_from, i_to, x, residual=None):
        # `residual` is accepted and ignored, exactly like the reference module.
        idxs = list(range(len(self.params)))[i_from:i_to]
        if not idxs:
            return x
        first, last = idxs[0], idxs[-1]
        B = x.shape[0]
        assert x.shape[1] == self.in_dims[first]

        tm = 256 if B >= 256 else _round_up(B, 8)
        Bp = _round_up(B, tm)

        # Pad + cast the activation ONCE; it stays padded (and in the compute
        # dtype) across all layer boundaries; slice/cast only at the very end.
        act = jnp.zeros((Bp, self.in_pads[first]), self.compute_dtype)
        act = act.at[:B, :self.in_dims[first]].set(x.astype(self.compute_dtype))
        for li in idxs:
            act = linear_forward_padded(act, self.w_pads[li], self.b_pads[li],
                                        out_dtype=self.compute_dtype, tm=tm)
        return act[:B, :self.out_dims[last]].astype(x.dtype)

    def forward_until(self, i, x):
        return self.forward_between(0, i + 1, x)

    def forward_from(self, i, x, residual):
        return self.forward_between(i + 1, len(self.params), x, residual)

    def __call__(self, x):
        # forward(x) == forward_from(-1, x, None)
        plan = self._fused_plan(x.shape[0])
        if plan is not None:
            tm, vmem_limit = plan
            return sequential_forward_fused(
                x, self.w_pads, self.b_pads, self.in_dims[0], self.out_dims[-1],
                self.compute_dtype, tm, vmem_limit)
        return self.forward_between(0, len(self.params), x)

    # -- fused-path planning -------------------------------------------------
    def _fused_batch_tile(self, B):
        Bp8 = _round_up(B, 8)
        if Bp8 <= 8:
            return Bp8
        # Aim for >= 2 batch tiles (keeps both v7x TensorCores busy); weights
        # are VMEM-resident, so a smaller tm costs no extra weight DMA.
        return min(512, _round_up((Bp8 + 1) // 2, 8))

    def _fused_plan(self, B):
        """Return (tm, vmem_limit_bytes) if the fused kernel fits VMEM, else None."""
        tm = self._fused_batch_tile(B)
        itemsize = self.compute_dtype.itemsize
        w_bytes = sum(2 * int(w.size) * itemsize for w in self.w_pads)
        b_bytes = sum(2 * int(b.size) * 4 for b in self.b_pads)
        io_bytes = 2 * tm * self.in_pads[0] * itemsize + 2 * tm * self.out_pads[-1] * 4
        act_bytes = 4 * tm * max(self.in_pads + self.out_pads) * 4  # headroom
        est = w_bytes + b_bytes + io_bytes + act_bytes
        if est > int(0.6 * self._vmem_cap):
            return None
        vmem_limit = int(min(0.85 * self._vmem_cap,
                             max(est + (8 << 20), 32 << 20)))
        return tm, vmem_limit


def init_linear_params(key, in_features, out_features):
    """Deterministic init mirroring nn.Linear.reset_parameters():
    kaiming_uniform(a=sqrt(5)) -> U(-1/sqrt(in), 1/sqrt(in)) for both."""
    kw, kb = jax.random.split(key)
    bound = 1.0 / math.sqrt(in_features)
    weight = jax.random.uniform(
        kw, (out_features, in_features), jnp.float32, -bound, bound)
    bias = jax.random.uniform(kb, (out_features,), jnp.float32, -bound, bound)
    return weight, bias


if __name__ == "__main__":
    batch = 8
    layer_dims = [(32, 128), (128, 64)]  # Sequential of two Linears: 32->128->64

    key = jax.random.PRNGKey(0)
    keys = jax.random.split(key, len(layer_dims) + 1)
    x = jax.random.normal(keys[0], (batch, layer_dims[0][0]), jnp.float32)
    params = [
        init_linear_params(keys[i + 1], fin, fout)
        for i, (fin, fout) in enumerate(layer_dims)
    ]

    # Reference: chain of F.linear in high-precision JAX.
    y_ref = x
    for w, b in params:
        y_ref = jax.lax.dot_general(
            y_ref, w,
            dimension_numbers=(((1,), (1,)), ((), ())),
            precision=jax.lax.Precision.HIGHEST,
            preferred_element_type=jnp.float32,
        ) + b
    y_ref = jax.block_until_ready(y_ref)

    # --- exact-precision configuration (f32 operands) ----------------------
    model_f32 = PallasSequential(params, compute_dtype=jnp.float32)
    y32_fused = jax.block_until_ready(model_f32(x))                       # fused path
    y32_layered = jax.block_until_ready(
        model_f32.forward_between(0, len(model_f32), x))                  # per-layer path
    y32_split = jax.block_until_ready(
        model_f32.forward_from(0, model_f32.forward_until(0, x), None))   # split API

    # --- default fast configuration (bf16 operands, f32 accumulation) ------
    model_bf16 = PallasSequential(params)  # compute_dtype=bf16
    yb_fused = jax.block_until_ready(model_bf16(x))
    yb_layered = jax.block_until_ready(
        model_bf16.forward_between(0, len(model_bf16), x))

    out_shape = (batch, layer_dims[-1][1])
    assert y32_fused.shape == out_shape and yb_fused.shape == out_shape
    assert jnp.allclose(y32_fused, y_ref, atol=1e-3, rtol=1e-3)
    assert jnp.allclose(y32_layered, y_ref, atol=1e-3, rtol=1e-3)
    assert jnp.allclose(y32_split, y_ref, atol=1e-3, rtol=1e-3)
    assert jnp.allclose(yb_fused, y_ref, atol=5e-2, rtol=5e-2)
    assert jnp.allclose(yb_layered, y_ref, atol=5e-2, rtol=5e-2)
    assert jnp.allclose(yb_fused, yb_layered, atol=5e-2, rtol=5e-2)

    print("KERNEL_OK")
</pallas_src>

<mosaic_0001>
module attributes {stable_mosaic.version = 11 : i64} {
  func.func @kernel(%arg0: i32, %arg1: memref<8x128xf32, #tpu.memory_space<vmem>>, %arg2: memref<128x128xf32, #tpu.memory_space<vmem>>, %arg3: memref<128x128xf32, #tpu.memory_space<vmem>>, %arg4: memref<1x128xf32, #tpu.memory_space<vmem>>, %arg5: memref<1x128xf32, #tpu.memory_space<vmem>>, %arg6: memref<8x128xf32, #tpu.memory_space<vmem>>) attributes {dimension_semantics = [#tpu.dimension_semantics<parallel>], iteration_bounds = array<i64: 1>, scalar_prefetch = 0 : i64, scratch_operands = 0 : i64, tpu.core_type = #tpu.core_type<tc>, window_params = [{transform_indices = @transform_0, window_bounds = array<i64: 8, 128>}, {pipeline_mode = #tpu.pipeline_mode<synchronous>, transform_indices = @transform_1, window_bounds = array<i64: 128, 128>}, {pipeline_mode = #tpu.pipeline_mode<synchronous>, transform_indices = @transform_2, window_bounds = array<i64: 128, 128>}, {pipeline_mode = #tpu.pipeline_mode<synchronous>, transform_indices = @transform_3, window_bounds = array<i64: 1, 128>}, {pipeline_mode = #tpu.pipeline_mode<synchronous>, transform_indices = @transform_4, window_bounds = array<i64: 1, 128>}, {transform_indices = @transform_5, window_bounds = array<i64: 8, 128>}]} {
    %c0 = arith.constant 0 : index
    %c0_0 = arith.constant 0 : index
    %0 = vector.load %arg1[%c0, %c0_0] : memref<8x128xf32, #tpu.memory_space<vmem>>, vector<8x128xf32>
    %c0_1 = arith.constant 0 : index
    %c0_2 = arith.constant 0 : index
    %1 = vector.load %arg2[%c0_1, %c0_2] : memref<128x128xf32, #tpu.memory_space<vmem>>, vector<128x128xf32>
    %cst = arith.constant dense<0.000000e+00> : vector<8x128xf32>
    %2 = tpu.matmul %0, %1, %cst {dimension_numbers = #tpu.dot_dimension_numbers<[1], [0], [0], [1], [0, 0, 1, 1], [], []>} : vector<8x128xf32>, vector<128x128xf32>, vector<8x128xf32> -> vector<8x128xf32>
    %c0_3 = arith.constant 0 : index
    %c0_4 = arith.constant 0 : index
    %3 = vector.load %arg4[%c0_3, %c0_4] : memref<1x128xf32, #tpu.memory_space<vmem>>, vector<1x128xf32>
    %4 = vector.broadcast %3 : vector<1x128xf32> to vector<8x128xf32>
    %5 = arith.addf %2, %4 : vector<8x128xf32>
    %c0_5 = arith.constant 0 : index
    %c0_6 = arith.constant 0 : index
    %6 = vector.load %arg3[%c0_5, %c0_6] : memref<128x128xf32, #tpu.memory_space<vmem>>, vector<128x128xf32>
    %cst_7 = arith.constant dense<0.000000e+00> : vector<8x128xf32>
    %7 = tpu.matmul %5, %6, %cst_7 {dimension_numbers = #tpu.dot_dimension_numbers<[1], [0], [0], [1], [0, 0, 1, 1], [], []>} : vector<8x128xf32>, vector<128x128xf32>, vector<8x128xf32> -> vector<8x128xf32>
    %c0_8 = arith.constant 0 : index
    %c0_9 = arith.constant 0 : index
    %8 = vector.load %arg5[%c0_8, %c0_9] : memref<1x128xf32, #tpu.memory_space<vmem>>, vector<1x128xf32>
    %9 = vector.broadcast %8 : vector<1x128xf32> to vector<8x128xf32>
    %10 = arith.addf %7, %9 : vector<8x128xf32>
    %c0_10 = arith.constant 0 : index
    %c0_11 = arith.constant 0 : index
    %11 = vector.load %arg6[%c0_10, %c0_11] : memref<8x128xf32, #tpu.memory_space<vmem>>, vector<8x128xf32>
    tpu.vector_store %arg6[%c0_10, %c0_11], %10 {strides = array<i32>} : memref<8x128xf32, #tpu.memory_space<vmem>>, vector<8x128xf32>,
    return
  }
  func.func @transform_0(%arg0: i32) -> (i32, i32) {
    %c0_i32 = arith.constant 0 : i32
    %c0_i32_0 = arith.constant 0 : i32
    return %arg0, %c0_i32 : i32, i32
  }
  func.func @transform_1(%arg0: i32) -> (i32, i32) {
    %c0_i32 = arith.constant 0 : i32
    %c0_i32_0 = arith.constant 0 : i32
    %c0_i32_1 = arith.constant 0 : i32
    return %c0_i32, %c0_i32_0 : i32, i32
  }
  func.func @transform_2(%arg0: i32) -> (i32, i32) {
    %c0_i32 = arith.constant 0 : i32
    %c0_i32_0 = arith.constant 0 : i32
    %c0_i32_1 = arith.constant 0 : i32
    return %c0_i32, %c0_i32_0 : i32, i32
  }
  func.func @transform_3(%arg0: i32) -> (i32, i32) {
    %c0_i32 = arith.constant 0 : i32
    %c0_i32_0 = arith.constant 0 : i32
    %c0_i32_1 = arith.constant 0 : i32
    return %c0_i32, %c0_i32_0 : i32, i32
  }
  func.func @transform_4(%arg0: i32) -> (i32, i32) {
    %c0_i32 = arith.constant 0 : i32
    %c0_i32_0 = arith.constant 0 : i32
    %c0_i32_1 = arith.constant 0 : i32
    return %c0_i32, %c0_i32_0 : i32, i32
  }
  func.func @transform_5(%arg0: i32) -> (i32, i32) {
    %c0_i32 = arith.constant 0 : i32
    %c0_i32_0 = arith.constant 0 : i32
    return %arg0, %c0_i32 : i32, i32
  }
}

</mosaic_0001>

<bundles_post_ra>
// kernel: tpu_custom_call.1
= control target key start
LH: loop header
LB: loop body
LE: loop exit
PB: predicated region body
PF: predicated region fallthrough
CT: control target
= control target key end

     0   :  { %10 = vsyncpa [#allocation3], 0  ;;  %s554_s0 = inlined_call_operand.hbm [shape: f32[8,128], index: 0, kind: input, shape index: {}]   ;;  %s555_s1 = inlined_call_operand.hbm [shape: f32[128,128], index: 1, kind: input, shape index: {}]   ;;  %s556_s2 = inlined_call_operand.hbm [shape: f32[128,128], index: 2, kind: input, shape index: {}]   ;;  %s557_s3 = inlined_call_operand.vmem [shape: f32[1,128], index: 3, kind: input, shape index: {}]   ;;  %s558_s4 = inlined_call_operand.vmem [shape: f32[1,128], index: 4, kind: input, shape index: {}]   ;;  %s559_s5 = inlined_call_operand.hbm [shape: f32[8,128], index: 5, kind: output, shape index: {}]  }
   0x1   :  { %11 = vsyncpa [#allocation6], 0 }
   0x2   :  { %12 = vsyncpa [#allocation4], 0  ;;  %s464_s18 = smov [#allocation5]  }
   0x3   :  { %s28_s19 = sshll.u32 %s464_s18, 4  ;;  %s29_s19 = int_to_ptr.vmem [resolvable:$true] %s28_s19 }
   0x4   :  { %s386_s20 = scalar_lea.vmem %s29_s19, 2048  ;;  %p391_p1 = scmp.lt.s32.totalorder %s29_s19, %s29_s19 }
   0x5   :  { %p387_p0 = scmp.ne.s32.totalorder %s29_s19, %s386_s20  ;;  %p392_p2 = scmp.lt.s32.totalorder %s386_s20, %s386_s20 }
   0x7   :  { %p393_p3 = por %p392_p2, %p391_p1 }
   0x9   :  { %p394_p4 = pnand %p393_p3, %p387_p0 }
   0xb   :  { %397 = shalt.err (!%p394_p4)
}
   0xc   :  { %s465_s21 = smov 128   ;;  %s466_s22 = smov 8  }
   0xd   :  { %34 = dma.hbm_to_vmem [thread:$0]  %s555_s1, 2048, %s29_s19, [#allocation6], %s465_s21, %s465_s21, %s466_s22  }
   0xe   :  { %s467_s25 = smov [#allocation2]   ;;  %s468_s27 = smov [#allocation7]  }
   0xf   :  { %s19_s26 = sshll.u32 %s467_s25, 4  ;;  %s40_s28 = sshll.u32 %s468_s27, 4  ;;  %s20_s26 = int_to_ptr.vmem [resolvable:$true] %s19_s26  ;;  %s41_s28 = int_to_ptr.vmem [resolvable:$true] %s40_s28 }
  0x10   :  { %s406_s29 = scalar_lea.vmem %s20_s26, 128  ;;  %p411_p6 = scmp.lt.s32.totalorder %s20_s26, %s20_s26 }
  0x11   :  { %p407_p5 = scmp.ne.s32.totalorder %s20_s26, %s406_s29  ;;  %p412_p7 = scmp.lt.s32.totalorder %s406_s29, %s406_s29 }
  0x13   :  { %p413_p8 = por %p412_p7, %p411_p6 }
  0x15   :  { %p414_p9 = pnand %p413_p8, %p407_p5 }
  0x17   :  { %417 = shalt.err (!%p414_p9)
}
  0x18   :  { %22 = dma.hbm_to_vmem [thread:$0]  %s554_s0, 128, %s20_s26, [#allocation3]  }
  0x19   :  { %s426_s7 = scalar_lea.vmem %s41_s28, 2048  ;;  %p431_p11 = scmp.lt.s32.totalorder %s41_s28, %s41_s28 }
  0x1a   :  { %p427_p10 = scmp.ne.s32.totalorder %s41_s28, %s426_s7  ;;  %p432_p12 = scmp.lt.s32.totalorder %s426_s7, %s426_s7 }
  0x1c   :  { %p433_p13 = por %p432_p12, %p431_p11 }
  0x1e   :  { %p434_p0 = pnand %p433_p13, %p427_p10 }
  0x20   :  { %437 = shalt.err (!%p434_p0)
}
  0x21   :  { %46 = dma.hbm_to_vmem [thread:$0]  %s556_s2, 2048, %s41_s28, [#allocation6], %s465_s21, %s465_s21, %s466_s22  }
  0x22   :  { %458 = dma.done.wait [#allocation3], 128  }
  0x23   :  { %459 = vsyncadd [#allocation3], 4294967168 }
  0x24   :  { %460 = dma.done.wait [#allocation6], 4096  }
  0x25   :  { %461 = vsyncadd [#allocation6], 4294963200  ;;  %v469_v0 = vmov 0.0   ;;  %vm470_vm0 = vmmov 0   ;;  %v76_v1 = vld [vmem:[#allocation5 + $0x78] sm:$0xff]  ;;  %v75_v2 = vld [vmem:[#allocation5 + $0x70] sm:$0xff] }
  0x26   :  { %300 = vmatprep.subr.mxu0 %v469_v0  ;;  %332 = vmatprep.mubr.msk.f32.mxu0 %vm470_vm0, %v469_v0  ;;  %v74_v3 = vld [vmem:[#allocation5 + $0x68] sm:$0xff]  ;;  %v73_v4 = vld [vmem:[#allocation5 + $0x60] sm:$0xff]  ;;  %v169_v5 = vld [vmem:[#allocation7 + $0x78] sm:$0xff]  ;;  %s471_s11 = smov [#allocation8]  }
  0x27   :  { %335 = vmatprep.subr.mxu1 %v469_v0  ;;  %367 = vmatprep.mubr.msk.f32.mxu1 %vm470_vm0, %v469_v0  ;;  %v72_v6 = vld [vmem:[#allocation5 + $0x58] sm:$0xff]  ;;  %v168_v7 = vld [vmem:[#allocation7 + $0x70] sm:$0xff]  ;;  %v167_v8 = vld [vmem:[#allocation7 + $0x68] sm:$0xff]  ;;  %s254_s12 = sshll.u32 %s471_s11, 4  ;;  %s255_s12 = int_to_ptr.vmem [resolvable:$true] %s254_s12 }
  0x28   :  { %301 = vmatpush3.msra.mxu0 %v76_v1  ;;  %336 = vmatpush3.msra.mxu1 %v169_v5  ;;  %v71_v9 = vld [vmem:[#allocation5 + $0x50] sm:$0xff]  ;;  %v166_v10 = vld [vmem:[#allocation7 + $0x60] sm:$0xff]  ;;  %v70_v11 = vld [vmem:[#allocation5 + $0x48] sm:$0xff]  ;;  %s438_s13 = scalar_lea.vmem %s255_s12, 128  ;;  %p443_p2 = scmp.lt.s32.totalorder %s255_s12, %s255_s12 }
  0x29   :  { %302 = vmatprep.subr.mxu0 %v469_v0  ;;  %337 = vmatprep.subr.mxu1 %v469_v0  ;;  %v165_v12 = vld [vmem:[#allocation7 + $0x58] sm:$0xff]  ;;  %v69_v13 = vld [vmem:[#allocation5 + $0x40] sm:$0xff]  ;;  %v164_v14 = vld [vmem:[#allocation7 + $0x50] sm:$0xff]  ;;  %p439_p1 = scmp.ne.s32.totalorder %s255_s12, %s438_s13  ;;  %p444_p3 = scmp.lt.s32.totalorder %s438_s13, %s438_s13 }
  0x2a   :  { %303 = vmatpush3.msra.mxu0 %v75_v2  ;;  %338 = vmatpush3.msra.mxu1 %v168_v7  ;;  %v68_v15 = vld [vmem:[#allocation5 + $0x38] sm:$0xff]  ;;  %v163_v16 = vld [vmem:[#allocation7 + $0x48] sm:$0xff]  ;;  %v67_v17 = vld [vmem:[#allocation5 + $0x30] sm:$0xff] }
  0x2b   :  { %304 = vmatprep.subr.mxu0 %v469_v0  ;;  %339 = vmatprep.subr.mxu1 %v469_v0  ;;  %v162_v18 = vld [vmem:[#allocation7 + $0x40] sm:$0xff]  ;;  %v66_v19 = vld [vmem:[#allocation5 + $0x28] sm:$0xff]  ;;  %v161_v20 = vld [vmem:[#allocation7 + $0x38] sm:$0xff]  ;;  %p445_p4 = por %p444_p3, %p443_p2 }
  0x2c   :  { %305 = vmatpush3.msra.mxu0 %v74_v3  ;;  %340 = vmatpush3.msra.mxu1 %v167_v8  ;;  %v65_v21 = vld [vmem:[#allocation5 + $0x20] sm:$0xff]  ;;  %v160_v22 = vld [vmem:[#allocation7 + $0x30] sm:$0xff]  ;;  %v64_v23 = vld [vmem:[#allocation5 + $0x18] sm:$0xff] }
  0x2d   :  { %306 = vmatprep.subr.mxu0 %v469_v0  ;;  %341 = vmatprep.subr.mxu1 %v469_v0  ;;  %v159_v24 = vld [vmem:[#allocation7 + $0x28] sm:$0xff]  ;;  %v63_v25 = vld [vmem:[#allocation5 + $0x10] sm:$0xff]  ;;  %v158_v26 = vld [vmem:[#allocation7 + $0x20] sm:$0xff]  ;;  %p446_p5 = pnand %p445_p4, %p439_p1 }
  0x2e   :  { %307 = vmatpush3.msra.mxu0 %v73_v4  ;;  %342 = vmatpush3.msra.mxu1 %v166_v10  ;;  %v62_v27 = vld [vmem:[#allocation5 + $0x8] sm:$0xff]  ;;  %v157_v28 = vld [vmem:[#allocation7 + $0x18] sm:$0xff]  ;;  %v61_v29 = vld [vmem:[#allocation5] sm:$0xff] }
  0x2f   :  { %308 = vmatprep.subr.mxu0 %v469_v0  ;;  %343 = vmatprep.subr.mxu1 %v469_v0  ;;  %v60_v30 = vld [vmem:[#allocation2] sm:$0xff]  ;;  %v156_v31 = vld [vmem:[#allocation7 + $0x10] sm:$0xff]  ;;  %v155_v32 = vld [vmem:[#allocation7 + $0x8] sm:$0xff] }
  0x30   :  { %309 = vmatpush3.msra.mxu0 %v72_v6  ;;  %344 = vmatpush3.msra.mxu1 %v165_v12  ;;  %v154_v33 = vld [vmem:[#allocation7] sm:$0xff]  ;;  %v264_v34 = vld [vmem:[%s557_s3] ss:$0 sm:$0xff] }
  0x31   :  { %310 = vmatprep.subr.mxu0 %v469_v0  ;;  %345 = vmatprep.subr.mxu1 %v469_v0  ;;  %v265_v38 = vld [vmem:[%s558_s4] ss:$0 sm:$0xff] }
  0x32   :  { %311 = vmatpush3.msra.mxu0 %v71_v9  ;;  %346 = vmatpush3.msra.mxu1 %v164_v14 }
  0x33   :  { %312 = vmatprep.subr.mxu0 %v469_v0  ;;  %347 = vmatprep.subr.mxu1 %v469_v0 }
  0x34   :  { %313 = vmatpush3.msra.mxu0 %v70_v11  ;;  %348 = vmatpush3.msra.mxu1 %v163_v16 }
  0x35   :  { %314 = vmatprep.subr.mxu0 %v469_v0  ;;  %349 = vmatprep.subr.mxu1 %v469_v0 }
  0x36   :  { %315 = vmatpush3.msra.mxu0 %v69_v13  ;;  %350 = vmatpush3.msra.mxu1 %v162_v18 }
  0x37   :  { %316 = vmatprep.subr.mxu0 %v469_v0  ;;  %351 = vmatprep.subr.mxu1 %v469_v0 }
  0x38   :  { %317 = vmatpush3.msra.mxu0 %v68_v15  ;;  %352 = vmatpush3.msra.mxu1 %v161_v20 }
  0x39   :  { %318 = vmatprep.subr.mxu0 %v469_v0  ;;  %353 = vmatprep.subr.mxu1 %v469_v0 }
  0x3a   :  { %319 = vmatpush3.msra.mxu0 %v67_v17  ;;  %354 = vmatpush3.msra.mxu1 %v160_v22 }
  0x3b   :  { %320 = vmatprep.subr.mxu0 %v469_v0  ;;  %355 = vmatprep.subr.mxu1 %v469_v0 }
  0x3c   :  { %321 = vmatpush3.msra.mxu0 %v66_v19  ;;  %356 = vmatpush3.msra.mxu1 %v159_v24 }
  0x3d   :  { %322 = vmatprep.subr.mxu0 %v469_v0  ;;  %357 = vmatprep.subr.mxu1 %v469_v0 }
  0x3e   :  { %323 = vmatpush3.msra.mxu0 %v65_v21  ;;  %358 = vmatpush3.msra.mxu1 %v158_v26 }
  0x3f   :  { %324 = vmatprep.subr.mxu0 %v469_v0  ;;  %359 = vmatprep.subr.mxu1 %v469_v0 }
  0x40   :  { %325 = vmatpush3.msra.mxu0 %v64_v23  ;;  %360 = vmatpush3.msra.mxu1 %v157_v28 }
  0x41   :  { %326 = vmatprep.subr.mxu0 %v469_v0  ;;  %361 = vmatprep.subr.mxu1 %v469_v0 }
  0x42   :  { %327 = vmatpush3.msra.mxu0 %v63_v25  ;;  %362 = vmatpush3.msra.mxu1 %v156_v31 }
  0x43   :  { %328 = vmatprep.subr.mxu0 %v469_v0  ;;  %363 = vmatprep.subr.mxu1 %v469_v0 }
  0x44   :  { %329 = vmatpush3.msra.mxu0 %v62_v27  ;;  %364 = vmatpush3.msra.mxu1 %v155_v32 }
  0x45   :  { %330 = vmatprep.subr.mxu0 %v469_v0  ;;  %365 = vmatprep.subr.mxu1 %v469_v0 }
  0x46   :  { %331 = vmatpush3.msra.mxu0 %v61_v29  ;;  %366 = vmatpush3.msra.mxu1 %v154_v33 }
  0x47   :  { %333 = vmatmul.mubr.f32.vlgmr.msra.gmra.mxu0 %v60_v30 }
 0x107   :  { %v150_v35 = vpop.f32.mrf.mxu0 }
 0x108   :  { %v151_v36 = vadd.f32 %v264_v34, %v150_v35 }
 0x109   :  { %v334_v37 = vpop.f32.mrf.mxu0 }
 0x10a   :  { %368 = vmatmul.mubr.f32.vlgmr.msra.gmra.mxu1 %v151_v36 }
 0x1ca   :  { %v243_v39 = vpop.f32.mrf.mxu1 }
 0x1cb   :  { %v244_v40 = vadd.f32 %v265_v38, %v243_v39 }
 0x1cc   :  { %v369_v41 = vpop.f32.mrf.mxu1 }
 0x1cd   :  { %247 = vst [vmem:[#allocation8] sm:$0xff] %v244_v40 }
 0x1ce   :  { %449 = shalt.err (!%p446_p5)
}
 0x1cf   :  { %257 = dma.vmem_to_hbm [thread:$0]  %s255_s12, 128, %s559_s5, [#allocation4]  }
 0x1d0   :  { %462 = dma.done.wait [#allocation4], 128  }
 0x1d1   :  { %463 = vsyncadd [#allocation4], 4294967168 }
 0x1d2   :  { %261 = vsyncpa [#allocation3], 1 }
 0x1d3   :  { %262 = vsyncpa [#allocation6], 1 }
 0x1d4   :  { %263 = vsyncpa [#allocation4], 1 }

</bundles_post_ra>
